<compile_context>
chip_gen: v5e
topology: v5e:2x2
jax: 0.10.0
libtpu: 0.0.40
codegen_flags: <defaults>
</compile_context>

<pallas_src>
import functools
import math
from typing import NamedTuple

import jax
import jax.numpy as jnp
from jax.experimental import pallas as pl
from jax.experimental.pallas import tpu as pltpu


_MIN_TILE = 8  # sublane granularity for the batch axis


# ----------------------------------------------------------------------------
# Parameters (pre-transposed + lane-dense padded + pre-cast, done ONCE at init)
# ----------------------------------------------------------------------------

class CategoricalParams(NamedTuple):
    w: jax.Array          # (num_inputs, Np) pre-transposed weight (compute dtype)
    b: jax.Array          # (1, Np) bias, f32 (adds into the f32 MXU accumulator)
    num_outputs: int      # true (unpadded) number of outputs


def _round_up(x: int, m: int) -> int:
    return (x + m - 1) // m * m


def init_categorical_params(key, num_inputs, num_outputs):
    """nn.Linear-style init: U(-1/sqrt(fan_in), 1/sqrt(fan_in)).
    Weight is returned already transposed: (num_inputs, num_outputs)."""
    k_w, k_b = jax.random.split(key)
    bound = 1.0 / math.sqrt(num_inputs)
    w_t = jax.random.uniform(
        k_w, (num_inputs, num_outputs), jnp.float32, -bound, bound)
    bias = jax.random.uniform(
        k_b, (num_outputs,), jnp.float32, -bound, bound)
    return w_t, bias


def pack_params(w_t, bias, compute_dtype=jnp.float32) -> CategoricalParams:
    """One-time layout prep:
      * output dim zero-padded to a lane-dense multiple of 128,
      * weight stored pre-transposed AND pre-cast to compute_dtype (bf16 on
        v6e/v7x halves the weight DMA and removes a per-grid-step VPU cast),
      * bias kept f32 since it is added to the f32 accumulator."""
    num_inputs, num_outputs = w_t.shape
    n_pad = _round_up(num_outputs, 128)
    w_pad = jnp.zeros((num_inputs, n_pad), compute_dtype).at[:, :num_outputs].set(
        w_t.astype(compute_dtype))
    b_pad = jnp.zeros((1, n_pad), jnp.float32).at[0, :num_outputs].set(
        bias.astype(jnp.float32))
    return CategoricalParams(w=w_pad, b=b_pad, num_outputs=num_outputs)


# ----------------------------------------------------------------------------
# Kernels
# ----------------------------------------------------------------------------

def _masked_logits(x_ref, w_ref, b_ref, num_outputs):
    """f32 logits with padded columns forced to -1e30; plus column iota/mask.
    x is cast in-kernel to the (pre-cast) weight dtype; accumulation stays f32
    via preferred_element_type."""
    x = x_ref[...].astype(w_ref.dtype)
    logits = jnp.dot(x, w_ref[...], preferred_element_type=jnp.float32) + b_ref[...]
    col = jax.lax.broadcasted_iota(jnp.int32, logits.shape, 1)
    valid = col < num_outputs
    logits = jnp.where(valid, logits, jnp.float32(-1e30))
    return logits, col, valid


def _linear_kernel(x_ref, w_ref, b_ref, o_ref, *, num_outputs):
    # Single MXU matmul + bias add; only the `num_outputs` valid columns are
    # written back (HBM bytes dominate this kernel; masked vst is fine).
    x = x_ref[...].astype(w_ref.dtype)
    acc = jnp.dot(x, w_ref[...], preferred_element_type=jnp.float32)
    logits = acc + b_ref[...]
    o_ref[...] = logits[:, :num_outputs].astype(o_ref.dtype)


def _logp_entropy_kernel(x_ref, w_ref, b_ref, a_ref, alp_ref, ent_ref, *,
                         num_outputs):
    # Fused: linear -> log_softmax -> gather(action) & per-row entropy.
    # Logits stay in VMEM/vregs; only (tb, 1) results are written back.
    # Slim math (no full log_probs / probs tensors):
    #   alp = sum(onehot * logits) - log_z
    #   ent = log_z - (1/s) * sum(e * logits)     (reciprocal on the EUP)
    logits, col, valid = _masked_logits(x_ref, w_ref, b_ref, num_outputs)
    m = jnp.max(logits, axis=-1, keepdims=True)
    e = jnp.where(valid, jnp.exp(logits - m), 0.0)
    s = jnp.sum(e, axis=-1, keepdims=True)
    log_z = m + jnp.log(s)
    inv_s = pl.reciprocal(s, approx=True)
    onehot = col == a_ref[...]                      # (tb, 1) actions broadcast
    alp_ref[...] = jnp.sum(jnp.where(onehot, logits, 0.0),
                           axis=-1, keepdims=True) - log_z
    ent_ref[...] = log_z - inv_s * jnp.sum(jnp.where(valid, e * logits, 0.0),
                                           axis=-1, keepdims=True)


def _argmax_kernel(x_ref, w_ref, b_ref, a_ref, *, num_outputs):
    # Fused deterministic sample(): argmax over softmax == argmax over logits.
    logits, col, _ = _masked_logits(x_ref, w_ref, b_ref, num_outputs)
    m = jnp.max(logits, axis=-1, keepdims=True)
    a_ref[...] = jnp.min(jnp.where(logits == m, col, num_outputs),
                         axis=-1, keepdims=True)


# ----------------------------------------------------------------------------
# Tiling / VMEM budgeting helpers
# ----------------------------------------------------------------------------

def _default_batch_tile(k, x_itemsize):
    """Size the x tile from a VMEM byte budget: ~4 MiB on the 128-MiB parts
    (v5e/v6e), ~2 MiB otherwise (v7x's 64 MiB).  Big tiles amortize the
    ~0.35 us per-grid-step overhead for this memory-bound head."""
    try:
        big_vmem = pltpu.get_tpu_info().vmem_capacity_bytes > (64 << 20)
    except Exception:
        big_vmem = False
    budget = (4 << 20) if big_vmem else (2 << 20)
    tile = budget // max(1, k * x_itemsize)
    return int(max(128, min(2048, _round_up(int(tile), _MIN_TILE))))


def _batch_tiling(batch, batch_tile):
    """Pick (tile, grid).  No wrapper-side padding: the last block may be
    ragged (Pallas masks its reads/writes).  When the batch allows it, force
    >= 2 grid steps so both v7x TensorCores get work ("parallel" axis)."""
    if batch < _MIN_TILE:
        return batch, 1                       # block == full array (allowed)
    tb = min(batch_tile, _round_up(batch, _MIN_TILE))
    if batch >= 2 * _MIN_TILE:
        tb = min(tb, _round_up(pl.cdiv(batch, 2), _MIN_TILE))
    tb = max(_MIN_TILE, tb)
    return tb, pl.cdiv(batch, tb)


def _vmem_limit(tb, k, n_pad, x_itemsize, w_itemsize, out_row_bytes):
    """Explicit scoped-VMEM budget: double-buffered x tiles + resident W/b +
    double-buffered outputs + f32 logits temporaries, with 2x headroom."""
    need = (2 * tb * k * x_itemsize          # x (double-buffered)
            + 2 * k * n_pad * w_itemsize     # weight (worst case 2 buffers)
            + 2 * n_pad * 4                  # bias
            + 2 * tb * out_row_bytes         # outputs (double-buffered)
            + 2 * tb * n_pad * 4)            # in-kernel f32 logits temporaries
    return int(min(64 << 20, max(2 * need, 16 << 20)))


def _xwb_specs(tb, k, n_pad):
    # TODO(synk): mark the W/b specs pipeline_mode=pl.Buffered(1) (they never
    # change across the grid) once single-buffered inputs are supported by the
    # installed jax; saves k*n_pad*itemsize of resident VMEM.
    return [
        pl.BlockSpec((tb, k), lambda i: (i, 0)),      # x: batch-tiled
        pl.BlockSpec((k, n_pad), lambda i: (0, 0)),   # weight: resident
        pl.BlockSpec((1, n_pad), lambda i: (0, 0)),   # bias:   resident
    ]


# ----------------------------------------------------------------------------
# Wrappers
# ----------------------------------------------------------------------------

def categorical_forward(x, params: CategoricalParams, *, batch_tile=None):
    """Forward pass of Categorical: logits = x @ W^T + b, shape (B, num_outputs)."""
    batch, k = x.shape
    n = params.num_outputs
    n_pad = params.w.shape[1]
    tb, grid = _batch_tiling(
        batch, batch_tile or _default_batch_tile(k, x.dtype.itemsize))

    kernel = functools.partial(_linear_kernel, num_outputs=n)
    cost = pl.CostEstimate(
        flops=2 * batch * k * n_pad,
        transcendentals=0,
        bytes_accessed=int(x.nbytes + params.w.nbytes + params.b.nbytes
                           + batch * n * 4))
    return pl.pallas_call(
        kernel,
        out_shape=jax.ShapeDtypeStruct((batch, n), jnp.float32),
        grid=(grid,),
        in_specs=_xwb_specs(tb, k, n_pad),
        out_specs=pl.BlockSpec((tb, n), lambda i: (i, 0)),
        compiler_params=pltpu.CompilerParams(
            dimension_semantics=("parallel",),
            vmem_limit_bytes=_vmem_limit(tb, k, n_pad, x.dtype.itemsize,
                                         params.w.dtype.itemsize, n * 4)),
        cost_estimate=cost,
    )(x, params.w, params.b)


def categorical_logprobs_and_entropy(x, actions, params: CategoricalParams, *,
                                     batch_tile=None):
    """Fused linear + log_softmax + gather + entropy (logits never hit HBM).
    Returns (action_log_probs (B,1) f32, dist_entropy scalar)."""
    batch, k = x.shape
    n = params.num_outputs
    n_pad = params.w.shape[1]
    tb, grid = _batch_tiling(
        batch, batch_tile or _default_batch_tile(k, x.dtype.itemsize))
    actions = actions.reshape(batch, 1).astype(jnp.int32)

    kernel = functools.partial(_logp_entropy_kernel, num_outputs=n)
    cost = pl.CostEstimate(
        flops=2 * batch * k * n_pad + 8 * batch * n_pad,
        transcendentals=batch * n_pad + 2 * batch,   # exp + log + rcp
        bytes_accessed=int(x.nbytes + params.w.nbytes + params.b.nbytes
                           + actions.nbytes + 2 * batch * 4))
    alp, row_ent = pl.pallas_call(
        kernel,
        out_shape=(jax.ShapeDtypeStruct((batch, 1), jnp.float32),
                   jax.ShapeDtypeStruct((batch, 1), jnp.float32)),
        grid=(grid,),
        in_specs=_xwb_specs(tb, k, n_pad)
                 + [pl.BlockSpec((tb, 1), lambda i: (i, 0))],
        out_specs=(pl.BlockSpec((tb, 1), lambda i: (i, 0)),
                   pl.BlockSpec((tb, 1), lambda i: (i, 0))),
        compiler_params=pltpu.CompilerParams(
            dimension_semantics=("parallel",),
            vmem_limit_bytes=_vmem_limit(tb, k, n_pad, x.dtype.itemsize,
                                         params.w.dtype.itemsize, 3 * 4)),
        cost_estimate=cost,
    )(x, params.w, params.b, actions)

    dist_entropy = jnp.mean(row_ent[:, 0])
    return alp, dist_entropy


def categorical_sample_deterministic(x, params: CategoricalParams, *,
                                     batch_tile=None):
    """Fused deterministic sample(): argmax action indices, shape (B, 1) int32."""
    batch, k = x.shape
    n = params.num_outputs
    n_pad = params.w.shape[1]
    tb, grid = _batch_tiling(
        batch, batch_tile or _default_batch_tile(k, x.dtype.itemsize))

    kernel = functools.partial(_argmax_kernel, num_outputs=n)
    cost = pl.CostEstimate(
        flops=2 * batch * k * n_pad + 4 * batch * n_pad,
        transcendentals=0,
        bytes_accessed=int(x.nbytes + params.w.nbytes + params.b.nbytes
                           + batch * 4))
    return pl.pallas_call(
        kernel,
        out_shape=jax.ShapeDtypeStruct((batch, 1), jnp.int32),
        grid=(grid,),
        in_specs=_xwb_specs(tb, k, n_pad),
        out_specs=pl.BlockSpec((tb, 1), lambda i: (i, 0)),
        compiler_params=pltpu.CompilerParams(
            dimension_semantics=("parallel",),
            vmem_limit_bytes=_vmem_limit(tb, k, n_pad, x.dtype.itemsize,
                                         params.w.dtype.itemsize, 4)),
        cost_estimate=cost,
    )(x, params.w, params.b)


# TODO(synk): stochastic sample() (probs.multinomial) needs in-kernel PRNG
# (pltpu.prng_seed + pltpu.prng_random_bits Gumbel-max); left to plain JAX at
# the call site.


# ----------------------------------------------------------------------------
# Self-test
# ----------------------------------------------------------------------------

if __name__ == "__main__":
    key = jax.random.PRNGKey(0)
    k_x, k_p, k_a, k_x2, k_a2 = jax.random.split(key, 5)

    batch, num_inputs, num_outputs = 8, 32, 16
    x = jax.random.normal(k_x, (batch, num_inputs), jnp.float32)
    w_t, bias = init_categorical_params(k_p, num_inputs, num_outputs)
    params = pack_params(w_t, bias)                       # f32 weights
    params_bf16 = pack_params(w_t, bias, jnp.bfloat16)    # bf16 MXU path

    ref = x @ w_t + bias  # reference nn.Linear math

    # 1) forward, f32, single-tile grid.
    logits = categorical_forward(x, params)
    jax.block_until_ready(logits)
    assert logits.shape == (batch, num_outputs)
    assert jnp.allclose(logits, ref, atol=1e-5, rtol=1e-5)

    # 2) forward with pre-cast bf16 weights (native v6e/v7x MXU, f32 accum).
    logits_bf16 = categorical_forward(x, params_bf16)
    assert jnp.allclose(logits_bf16, ref, atol=5e-2, rtol=5e-2)

    # 3) forward, large ragged batch -> >=2 "parallel" grid steps, masked tail,
    #    no wrapper-side pad/slice.
    big_b = 1000
    x_big = jax.random.normal(k_x2, (big_b, num_inputs), jnp.float32)
    ref_big = x_big @ w_t + bias
    logits_big = categorical_forward(x_big, params)
    assert logits_big.shape == (big_b, num_outputs)
    assert jnp.allclose(logits_big, ref_big, atol=1e-5, rtol=1e-5)

    # 4) fused logprobs_and_entropy (logits stay in VMEM).
    actions = jax.random.randint(k_a, (batch, 1), 0, num_outputs)
    alp, ent = categorical_logprobs_and_entropy(x, actions, params)
    ref_logp = jax.nn.log_softmax(ref, axis=1)
    ref_alp = jnp.take_along_axis(ref_logp, actions, axis=1)
    ref_ent = -jnp.sum(ref_logp * jax.nn.softmax(ref, axis=1), axis=1).mean()
    assert alp.shape == (batch, 1)
    assert jnp.allclose(alp, ref_alp, atol=1e-4, rtol=1e-4)
    # entropy uses pl.reciprocal(approx=True) on the EUP -> ~1e-3 accuracy.
    assert jnp.allclose(ent, ref_ent, atol=1e-2, rtol=1e-2)

    # 5) fused logprobs_and_entropy on the ragged batch (masked tail rows).
    actions_big = jax.random.randint(k_a2, (big_b, 1), 0, num_outputs)
    alp_big, ent_big = categorical_logprobs_and_entropy(x_big, actions_big, params)
    ref_logp_big = jax.nn.log_softmax(ref_big, axis=1)
    ref_alp_big = jnp.take_along_axis(ref_logp_big, actions_big, axis=1)
    ref_ent_big = -jnp.sum(ref_logp_big * jax.nn.softmax(ref_big, axis=1),
                           axis=1).mean()
    assert alp_big.shape == (big_b, 1)
    assert jnp.allclose(alp_big, ref_alp_big, atol=1e-4, rtol=1e-4)
    assert jnp.allclose(ent_big, ref_ent_big, atol=1e-2, rtol=1e-2)

    # 6) fused deterministic sample(): the chosen index attains the max logit.
    act_det = categorical_sample_deterministic(x, params)
    jax.block_until_ready(act_det)
    assert act_det.shape == (batch, 1)
    sel = jnp.take_along_axis(ref, act_det, axis=1)[:, 0]
    assert jnp.all(ref.max(axis=1) - sel <= 1e-5)

    print("KERNEL_OK")
</pallas_src>

<mosaic_0001>
module attributes {stable_mosaic.version = 11 : i64} {
  func.func @_linear_kernel(%arg0: i32, %arg1: memref<8x32xf32, #tpu.memory_space<vmem>>, %arg2: memref<32x128xf32, #tpu.memory_space<vmem>>, %arg3: memref<1x128xf32, #tpu.memory_space<vmem>>, %arg4: memref<8x16xf32, #tpu.memory_space<vmem>>) attributes {dimension_semantics = [#tpu.dimension_semantics<parallel>], iteration_bounds = array<i64: 1>, scalar_prefetch = 0 : i64, scratch_operands = 0 : i64, tpu.core_type = #tpu.core_type<tc>, window_params = [{transform_indices = @transform_0, window_bounds = array<i64: 8, 32>}, {pipeline_mode = #tpu.pipeline_mode<synchronous>, transform_indices = @transform_1, window_bounds = array<i64: 32, 128>}, {pipeline_mode = #tpu.pipeline_mode<synchronous>, transform_indices = @transform_2, window_bounds = array<i64: 1, 128>}, {transform_indices = @transform_3, window_bounds = array<i64: 8, 16>}]} {
    %c0 = arith.constant 0 : index
    %c0_0 = arith.constant 0 : index
    %0 = vector.load %arg1[%c0, %c0_0] : memref<8x32xf32, #tpu.memory_space<vmem>>, vector<8x32xf32>
    %c0_1 = arith.constant 0 : index
    %c0_2 = arith.constant 0 : index
    %1 = vector.load %arg2[%c0_1, %c0_2] : memref<32x128xf32, #tpu.memory_space<vmem>>, vector<32x128xf32>
    %cst = arith.constant dense<0.000000e+00> : vector<8x128xf32>
    %2 = tpu.matmul %0, %1, %cst {dimension_numbers = #tpu.dot_dimension_numbers<[1], [0], [0], [1], [0, 0, 1, 1], [], []>} : vector<8x32xf32>, vector<32x128xf32>, vector<8x128xf32> -> vector<8x128xf32>
    %c0_3 = arith.constant 0 : index
    %c0_4 = arith.constant 0 : index
    %3 = vector.load %arg3[%c0_3, %c0_4] : memref<1x128xf32, #tpu.memory_space<vmem>>, vector<1x128xf32>
    %4 = vector.broadcast %3 : vector<1x128xf32> to vector<8x128xf32>
    %5 = arith.addf %2, %4 : vector<8x128xf32>
    %6 = vector.extract_strided_slice %5 {offsets = [0, 0], sizes = [8, 16], strides = [1, 1]} : vector<8x128xf32> to vector<8x16xf32>
    %c0_5 = arith.constant 0 : index
    %c0_6 = arith.constant 0 : index
    %7 = vector.load %arg4[%c0_5, %c0_6] : memref<8x16xf32, #tpu.memory_space<vmem>>, vector<8x16xf32>
    tpu.vector_store %arg4[%c0_5, %c0_6], %6 {strides = array<i32>} : memref<8x16xf32, #tpu.memory_space<vmem>>, vector<8x16xf32>,
    return
  }
  func.func @transform_0(%arg0: i32) -> (i32, i32) {
    %c0_i32 = arith.constant 0 : i32
    %c0_i32_0 = arith.constant 0 : i32
    return %arg0, %c0_i32 : i32, i32
  }
  func.func @transform_1(%arg0: i32) -> (i32, i32) {
    %c0_i32 = arith.constant 0 : i32
    %c0_i32_0 = arith.constant 0 : i32
    %c0_i32_1 = arith.constant 0 : i32
    return %c0_i32, %c0_i32_0 : i32, i32
  }
  func.func @transform_2(%arg0: i32) -> (i32, i32) {
    %c0_i32 = arith.constant 0 : i32
    %c0_i32_0 = arith.constant 0 : i32
    %c0_i32_1 = arith.constant 0 : i32
    return %c0_i32, %c0_i32_0 : i32, i32
  }
  func.func @transform_3(%arg0: i32) -> (i32, i32) {
    %c0_i32 = arith.constant 0 : i32
    %c0_i32_0 = arith.constant 0 : i32
    return %arg0, %c0_i32 : i32, i32
  }
}

</mosaic_0001>

<bundles_post_ra>
// kernel: tpu_custom_call.1
= control target key start
LH: loop header
LB: loop body
LE: loop exit
PB: predicated region body
PF: predicated region fallthrough
CT: control target
= control target key end

     0   :  { %8 = vsyncpa [#allocation3], 0  ;;  %s220_s0 = inlined_call_operand.hbm [shape: f32[8,32], index: 0, kind: input, shape index: {}]   ;;  %s221_s1 = inlined_call_operand.hbm [shape: f32[32,128], index: 1, kind: input, shape index: {}]   ;;  %s222_s2 = inlined_call_operand.vmem [shape: f32[1,128], index: 2, kind: input, shape index: {}]   ;;  %s223_s3 = inlined_call_operand.hbm [shape: f32[8,16], index: 3, kind: output, shape index: {}]  }
   0x1   :  { %9 = vsyncpa [#allocation6], 0 }
   0x2   :  { %10 = vsyncpa [#allocation4], 0  ;;  %s16_s14 = sshll.u32 %s220_s0, 4  ;;  %s183_s15 = smov [#allocation2]   ;;  %s17_s14 = int_to_ptr.hbm [resolvable:$true] %s16_s14 }
   0x3   :  { %s18_s16 = sshll.u32 %s183_s15, 4  ;;  %s26_s19 = sshll.u32 %s221_s1, 4  ;;  %s19_s16 = int_to_ptr.vmem [resolvable:$true] %s18_s16  ;;  %s27_s19 = int_to_ptr.hbm [resolvable:$true] %s26_s19 }
   0x4   :  { %21 = dma.hbm_to_vmem [thread:$0]  %s17_s14, 128, %s19_s16, [#allocation3]  }
   0x5   :  { %s184_s20 = smov [#allocation5]   ;;  %s185_s22 = smov 128  }
   0x6   :  { %s28_s21 = sshll.u32 %s184_s20, 4  ;;  %s186_s23 = smov 8   ;;  %s29_s21 = int_to_ptr.vmem [resolvable:$true] %s28_s21 }
   0x7   :  { %34 = dma.hbm_to_vmem [thread:$0]  %s27_s19, 512, %s29_s21, [#allocation6], %s185_s22, %s185_s22, %s186_s23  }
   0x8   :  { %177 = dma.done.wait [#allocation3], 128  }
   0x9   :  { %178 = vsyncadd [#allocation3], 4294967168 }
   0xa   :  { %179 = dma.done.wait [#allocation6], 512  }
   0xb   :  { %180 = vsyncadd [#allocation6], 4294966784  ;;  %v49_v0 = vld [vmem:[#allocation5 + $0x18] sm:$0xff]  ;;  %v48_v1 = vld [vmem:[#allocation5 + $0x10] sm:$0xff]  ;;  %vm54_vm0 = vcmask 261120   ;;  %s187_s24 = smov [#allocation7]  }
   0xc   :  { %70 = vmatpush.msra.mxu0 %v49_v0  ;;  %v47_v2 = vld [vmem:[#allocation5 + $0x8] sm:$0xff]  ;;  %v46_v3 = vld [vmem:[#allocation5] sm:$0xff]  ;;  %v45_v4 = vld [vmem:[#allocation2] sm:$0xff]  ;;  %s85_s25 = sshll.u32 %s187_s24, 4  ;;  %s87_s28 = sshll.u32 %s223_s3, 4  ;;  %vm78_vm1 = vcmask 130048   ;;  %s86_s25 = int_to_ptr.vmem [resolvable:$true] %s85_s25  ;;  %s88_s28 = int_to_ptr.hbm [resolvable:$true] %s87_s28 }
   0xd   :  { %v104_v5 = vld [vmem:[%s222_s2] ss:$0 sm:$0xff] }
   0xe   :  { %71 = vmatpush.msra.mxu0 %v48_v1 }
  0x10   :  { %72 = vmatpush.msra.mxu0 %v47_v2 }
  0x12   :  { %73 = vmatpush.msra.mxu0 %v46_v3 }
  0x13   :  { %98 = vmatmul.msk.f32.vlgmr.msra.gmra.mxu0 %vm54_vm0, %v45_v4 }
  0x90   :  { %v75_v6 = vpop.f32.mrf.mxu0 }
  0x91   :  { %v76_v7 = vadd.f32 %v104_v5, %v75_v6 }
  0x93   :  { %79 = vst.msk [vmem:[#allocation7] sm:$0xff] %vm78_vm1, %v76_v7 }
  0x94   :  { %90 = dma.vmem_to_hbm [thread:$0]  %s86_s25, 128, %s88_s28, [#allocation4]  }
  0x95   :  { %181 = dma.done.wait [#allocation4], 128  }
  0x96   :  { %182 = vsyncadd [#allocation4], 4294967168 }
  0x97   :  { %95 = vsyncpa [#allocation3], 1 }
  0x98   :  { %96 = vsyncpa [#allocation6], 1 }
  0x99   :  { %97 = vsyncpa [#allocation4], 1 }

</bundles_post_ra>
